<compile_context>
chip_gen: v6e
topology: v6e:2x2x1
jax: 0.10.0
libtpu: 0.0.40
codegen_flags: <defaults>
</compile_context>

<pallas_src>
import jax
import jax.numpy as jnp
from jax import lax
from jax.experimental import pallas as pl
from jax.experimental.pallas import tpu as pltpu


# ----------------------------------------------------------------------------------- #
# Kernel
# ----------------------------------------------------------------------------------- #
def _fused_upsample_conv_kernel(xm_ref, xh_ref, w_ref, b_ref, o_ref, imcol_ref):
    # xm_ref:    (1, TH, Wp, Cin)       bf16  main rows of the padded pre-upsample input
    # xh_ref:    (1, 2,  Wp, Cin)       bf16  2-row bottom halo (same array)
    # w_ref:     (2, 2, 3*Cin, 2*Cout)  bf16  phase weights [py, ky, (dxp,ci), (px,co)]
    # b_ref:     (1, 2*Cout)            f32   bias tiled over px
    # o_ref:     (1, TH, 2, W, 2*Cout)        output [.., Y, py, X, px*Cout+co]
    # imcol_ref: (TH+2, W, 3*Cin)       bf16  dxp-folded im2col staging (VMEM scratch)
    TH = xm_ref.shape[1]
    Cin = xm_ref.shape[3]
    W = o_ref.shape[3]
    N = o_ref.shape[4]      # 2 * Cout
    K = 3 * Cin

    # Stage the dxp-folded im2col slab once per tile, reading straight from the main
    # and halo blocks (replaces the old full-window copy AND the 12 per-tap shifted
    # loads):  imcol[r, x, dxp*Cin + c] = padded_input_window[r, x + dxp, c]
    imcol_ref[pl.ds(0, TH)] = jnp.concatenate(
        [xm_ref[0, :, pl.ds(d, W), :] for d in range(3)], axis=-1)
    imcol_ref[pl.ds(TH, 2)] = jnp.concatenate(
        [xh_ref[0, :, pl.ds(d, W), :] for d in range(3)], axis=-1)

    bias = b_ref[...]                                   # (1, N) f32

    for py in range(2):                                 # output row parity (unrolled)
        # Two matmuls per parity with K = 3*Cin (vs 6 K=Cin RMW taps before); f32
        # accumulation stays in values/MXU path, bias + ReLU folded into the epilogue.
        lhs0 = imcol_ref[pl.ds(py, TH)].reshape(TH * W, K)        # ky = 0 rows
        lhs1 = imcol_ref[pl.ds(py + 1, TH)].reshape(TH * W, K)    # ky = 1 rows
        acc = jnp.dot(lhs0, w_ref[py, 0], preferred_element_type=jnp.float32)
        acc = acc + jnp.dot(lhs1, w_ref[py, 1], preferred_element_type=jnp.float32)
        res = jnp.maximum(acc + bias, 0.0)                        # bias + ReLU (f32)
        o_ref[0, :, py, :, :] = res.reshape(TH, W, N).astype(o_ref.dtype)


# ----------------------------------------------------------------------------------- #
# Weight / tiling helpers
# ----------------------------------------------------------------------------------- #
def _phase_combined_weights(w_oihw):
    """Fold nearest-x2 upsampling into the 3x3 conv weights.

    Returns A of shape (2, 2, 3*Cin, 2*Cout) indexed [py, ky, dxp*Cin+ci, px*Cout+co]:
      out[2Y+py, 2X+px, co] = bias[co]
        + sum_{ky,dxp,ci} xpad[Y+py+ky, X+dxp, ci] * A[py, ky, dxp*Cin+ci, px*Cout+co]
    where xpad is the original (pre-upsample) NHWC input with a 1-px zero border.
    """
    cout, cin = w_oihw.shape[0], w_oihw.shape[1]
    w_hwio = jnp.transpose(w_oihw, (2, 3, 1, 0)).astype(jnp.float32)   # [dy, dx, ci, co]
    p = jnp.arange(2)[:, None, None]
    k = jnp.arange(2)[None, :, None]
    d = jnp.arange(3)[None, None, :]
    mv = ((p + d + 1) // 2 == p + k).astype(jnp.float32)               # [py, ky, dy]
    q = jnp.arange(2)[:, None, None]
    r = jnp.arange(3)[None, :, None]
    e = jnp.arange(3)[None, None, :]
    mh = ((q + e + 1) // 2 == r).astype(jnp.float32)                   # [px, dxp, dx]
    a = jnp.einsum('pkd,qre,deio->pkriqo', mv, mh, w_hwio)             # (2,2,3,Cin,2,Cout)
    return a.reshape(2, 2, 3 * cin, 2 * cout)                          # K=(dxp,ci), N=(px,co)


def _vmem_budget_bytes():
    """Generation-aware VMEM budget and scoped vmem limit (bytes)."""
    cap = 0
    try:
        cap = int(pltpu.get_tpu_info().vmem_capacity_bytes)
    except Exception:
        cap = 0
    if cap <= 0:
        cap = 64 * 1024 * 1024          # conservative fallback: v7x per-TensorCore VMEM
    # ~48 MiB on 128 MiB chips (v5e/v6e), ~24 MiB on 64 MiB/TC (v7x).
    budget = max(min(cap // 2 - (8 << 20), 48 << 20), 8 << 20)
    limit = max(min(budget + (16 << 20), cap - (4 << 20)), budget)
    return budget, limit


def _pick_tile_rows(H, W, Cin, Cout, B, out_itemsize, budget):
    """Largest even row tile dividing H that fits the VMEM budget while keeping
    >= ~8 total grid steps (pipeline depth / both v7x TensorCores busy)."""
    Wp, N, K = W + 2, 2 * Cout, 3 * Cin
    min_steps = max(1, (8 + B - 1) // B)

    def fits(th):
        s = th * W
        inp = 2 * (th * Wp * Cin + 2 * Wp * Cin) * 2            # double-buffered bf16 inputs
        wts = 2 * (2 * 2 * K * N) * 2 + 2 * N * 4               # weights + bias (double-buffered)
        out = 2 * (th * 2 * W * N) * out_itemsize               # double-buffered output block
        imcol = (th + 2) * W * K * 2                            # bf16 im2col scratch
        temps = 3 * s * N * 4                                   # f32 matmul/epilogue temps
        return inp + wts + out + imcol + temps <= budget

    divs = [t for t in range(2, H + 1, 2) if H % t == 0 and fits(t)]
    if not divs:
        return 2
    good = [t for t in divs if (H // t) >= min_steps]
    return max(good) if good else max(divs)


# ----------------------------------------------------------------------------------- #
# Wrapper
# ----------------------------------------------------------------------------------- #
def upsample_block_forward(prev_nchw, now_nchw, w_oihw, bias, *,
                           tile_rows=None, out_layout="NHWC",
                           out_dtype=jnp.bfloat16):
    """UpsampleBlock forward (ksp=(3,1,1), ReLU, no norm).

    NCHW inputs.  Default return is channels-last (NHWC) bf16 — the performance-
    recommended layout (no post-kernel transpose, half the output HBM write).
    Use out_layout="NCHW", out_dtype=jnp.float32 for exact PyTorch-module layout/dtype.
    """
    B, Cp, H, W = prev_nchw.shape
    Cn = now_nchw.shape[1]
    Cin = Cp + Cn
    Cout = w_oihw.shape[0]
    N = 2 * Cout
    assert H % 2 == 0, "pre-upsample height must be even"
    # NOTE: W % 16 == 0 keeps the in-kernel bf16 reshapes relayout-free (correct either way).
    # TODO(synk): support odd H / non-divisible tile_rows via edge masking.

    # Input glue on the SMALL pre-upsample tensor only (transpose+concat+cast+pad written
    # as one chain so XLA can fuse it; the 4x upsampled tensor is never materialised).
    x_nhwc = jnp.concatenate(
        [jnp.transpose(prev_nchw, (0, 2, 3, 1)),
         jnp.transpose(now_nchw, (0, 2, 3, 1))], axis=-1).astype(jnp.bfloat16)
    xp = jnp.pad(x_nhwc, ((0, 0), (1, 1), (1, 1), (0, 0)))              # (B, H+2, W+2, Cin)
    Wp = W + 2

    budget, vmem_limit = _vmem_budget_bytes()
    if tile_rows is None:
        tile_rows = _pick_tile_rows(H, W, Cin, Cout, B,
                                    jnp.dtype(out_dtype).itemsize, budget)
    TH = int(tile_rows)
    assert TH % 2 == 0 and H % TH == 0, (TH, H)

    w_k = _phase_combined_weights(w_oihw).astype(jnp.bfloat16)          # (2, 2, 3*Cin, N)
    b2 = jnp.tile(bias.astype(jnp.float32), 2)[None, :]                 # (1, N)

    out_k = pl.pallas_call(
        _fused_upsample_conv_kernel,
        out_shape=jax.ShapeDtypeStruct((B, H, 2, W, N), out_dtype),
        grid_spec=pltpu.PrefetchScalarGridSpec(
            num_scalar_prefetch=0,
            grid=(B, H // TH),
            in_specs=[
                # main TH rows of the padded pre-upsample input
                pl.BlockSpec((1, TH, Wp, Cin), lambda b, t: (b, t, 0, 0)),
                # 2-row bottom halo from the same array (finer row blocking)
                pl.BlockSpec((1, 2, Wp, Cin),
                             lambda b, t: (b, (t + 1) * (TH // 2), 0, 0)),
                # TODO(synk): pipeline_mode=pl.Buffered(1) on these two grid-invariant
                # operands would halve their VMEM footprint (matters for large Cin*Cout
                # on v7x's 64 MiB/TC).
                pl.BlockSpec((2, 2, 3 * Cin, N), lambda b, t: (0, 0, 0, 0)),
                pl.BlockSpec((1, N), lambda b, t: (0, 0)),
            ],
            out_specs=pl.BlockSpec((1, TH, 2, W, N), lambda b, t: (b, t, 0, 0, 0)),
            scratch_shapes=[
                pltpu.VMEM((TH + 2, W, 3 * Cin), jnp.bfloat16),   # dxp-folded im2col
            ],
        ),
        compiler_params=pltpu.CompilerParams(
            dimension_semantics=("parallel", "parallel"),
            vmem_limit_bytes=int(vmem_limit)),
    )(xp, xp, w_k, b2)

    # (B, H, 2, W, 2*Cout) row-major == (B, 2H, 2W, Cout) row-major: free reshape.
    out_nhwc = out_k.reshape(B, 2 * H, 2 * W, Cout)
    if out_layout == "NHWC":
        return out_nhwc
    assert out_layout == "NCHW", out_layout
    # Compatibility path only: adds one HBM transpose pass over the (large) output.
    return jnp.transpose(out_nhwc, (0, 3, 1, 2))


# ----------------------------------------------------------------------------------- #
# Pure-JAX (XLA) reference & self-test
# ----------------------------------------------------------------------------------- #
def reference_forward(prev_nchw, now_nchw, w_oihw, bias):
    x = jnp.concatenate([prev_nchw, now_nchw], axis=1)
    x = jnp.repeat(jnp.repeat(x, 2, axis=2), 2, axis=3)                 # nearest x2
    y = lax.conv_general_dilated(
        x, w_oihw, window_strides=(1, 1), padding=((1, 1), (1, 1)),
        dimension_numbers=("NCHW", "OIHW", "NCHW"),
        precision=lax.Precision.HIGHEST)
    y = y + bias[None, :, None, None]
    return jnp.maximum(y, 0.0)


if __name__ == "__main__":
    key = jax.random.PRNGKey(0)
    k1, k2, k3, k4 = jax.random.split(key, 4)

    # small shapes: batch=2, prev/now channels 2+2 -> c_in=4, c_out=8, spatial 16x16
    B, C_prev, C_now, H, W = 2, 2, 2, 16, 16
    Cin = C_prev + C_now
    Cout = 8

    prev_x = jax.random.normal(k1, (B, C_prev, H, W), dtype=jnp.float32)
    now_x = jax.random.normal(k2, (B, C_now, H, W), dtype=jnp.float32)
    w = 0.1 * jax.random.normal(k3, (Cout, Cin, 3, 3), dtype=jnp.float32)
    b = 0.1 * jax.random.normal(k4, (Cout,), dtype=jnp.float32)

    ref = jax.block_until_ready(reference_forward(prev_x, now_x, w, b))
    ref_nhwc = jnp.transpose(ref, (0, 2, 3, 1))

    # Default (performance) path: auto tile pick, channels-last bf16 output.
    out_nhwc = jax.block_until_ready(upsample_block_forward(prev_x, now_x, w, b))
    assert out_nhwc.shape == (B, 2 * H, 2 * W, Cout), out_nhwc.shape
    assert out_nhwc.dtype == jnp.bfloat16, out_nhwc.dtype
    err1 = float(jnp.max(jnp.abs(out_nhwc.astype(jnp.float32) - ref_nhwc)))
    assert jnp.allclose(out_nhwc.astype(jnp.float32), ref_nhwc,
                        atol=4e-2, rtol=4e-2), f"max abs err (NHWC/bf16) {err1}"

    # Drop-in compatibility path: explicit tiling (exercises row tiling + halo), NCHW, f32.
    out_nchw = jax.block_until_ready(
        upsample_block_forward(prev_x, now_x, w, b, tile_rows=4,
                               out_layout="NCHW", out_dtype=jnp.float32))
    assert out_nchw.shape == (B, Cout, 2 * H, 2 * W), out_nchw.shape
    err2 = float(jnp.max(jnp.abs(out_nchw - ref)))
    assert jnp.allclose(out_nchw, ref, atol=2e-2, rtol=2e-2), f"max abs err (NCHW/f32) {err2}"

    print("KERNEL_OK")
</pallas_src>

<mosaic_0001>
module attributes {stable_mosaic.version = 11 : i64} {
  func.func @_fused_upsample_conv_kernel(%arg0: i32, %arg1: i32, %arg2: memref<1x4x18x4xbf16, #tpu.memory_space<vmem>>, %arg3: memref<1x2x18x4xbf16, #tpu.memory_space<vmem>>, %arg4: memref<2x2x12x16xbf16, #tpu.memory_space<vmem>>, %arg5: memref<1x16xf32, #tpu.memory_space<vmem>>, %arg6: memref<1x4x2x16x16xbf16, #tpu.memory_space<vmem>>, %arg7: memref<6x16x12xbf16, #tpu.memory_space<vmem>>) attributes {dimension_semantics = [#tpu.dimension_semantics<parallel>, #tpu.dimension_semantics<parallel>], iteration_bounds = array<i64: 2, 4>, scalar_prefetch = 0 : i64, scratch_operands = 1 : i64, tpu.core_type = #tpu.core_type<tc>, window_params = [{transform_indices = @transform_0, window_bounds = array<i64: 1, 4, 18, 4>}, {transform_indices = @transform_1, window_bounds = array<i64: 1, 2, 18, 4>}, {pipeline_mode = #tpu.pipeline_mode<synchronous>, transform_indices = @transform_2, window_bounds = array<i64: 2, 2, 12, 16>}, {pipeline_mode = #tpu.pipeline_mode<synchronous>, transform_indices = @transform_3, window_bounds = array<i64: 1, 16>}, {transform_indices = @transform_4, window_bounds = array<i64: 1, 4, 2, 16, 16>}]} {
    %c0 = arith.constant 0 : index
    %c0_0 = arith.constant 0 : index
    %c0_1 = arith.constant 0 : index
    %c0_2 = arith.constant 0 : index
    %0 = vector.load %arg2[%c0, %c0_0, %c0_1, %c0_2] : memref<1x4x18x4xbf16, #tpu.memory_space<vmem>>, vector<1x4x16x4xbf16>
    %1 = vector.shape_cast %0 : vector<1x4x16x4xbf16> to vector<4x16x4xbf16>
    %c0_3 = arith.constant 0 : index
    %c0_4 = arith.constant 0 : index
    %c1 = arith.constant 1 : index
    %c0_5 = arith.constant 0 : index
    %2 = vector.load %arg2[%c0_3, %c0_4, %c1, %c0_5] : memref<1x4x18x4xbf16, #tpu.memory_space<vmem>>, vector<1x4x16x4xbf16>
    %3 = vector.shape_cast %2 : vector<1x4x16x4xbf16> to vector<4x16x4xbf16>
    %c0_6 = arith.constant 0 : index
    %c0_7 = arith.constant 0 : index
    %c2 = arith.constant 2 : index
    %c0_8 = arith.constant 0 : index
    %4 = vector.load %arg2[%c0_6, %c0_7, %c2, %c0_8] : memref<1x4x18x4xbf16, #tpu.memory_space<vmem>>, vector<1x4x16x4xbf16>
    %5 = vector.shape_cast %4 : vector<1x4x16x4xbf16> to vector<4x16x4xbf16>
    %6 = tpu.concatenate %1, %3, %5 in 2 : vector<4x16x4xbf16>, vector<4x16x4xbf16>, vector<4x16x4xbf16> -> vector<4x16x12xbf16>
    %c0_9 = arith.constant 0 : index
    %c0_10 = arith.constant 0 : index
    %c0_11 = arith.constant 0 : index
    %7 = vector.load %arg7[%c0_9, %c0_10, %c0_11] : memref<6x16x12xbf16, #tpu.memory_space<vmem>>, vector<4x16x12xbf16>
    tpu.vector_store %arg7[%c0_9, %c0_10, %c0_11], %6 {strides = array<i32>} : memref<6x16x12xbf16, #tpu.memory_space<vmem>>, vector<4x16x12xbf16>,
    %c0_12 = arith.constant 0 : index
    %c0_13 = arith.constant 0 : index
    %c0_14 = arith.constant 0 : index
    %c0_15 = arith.constant 0 : index
    %8 = vector.load %arg3[%c0_12, %c0_13, %c0_14, %c0_15] : memref<1x2x18x4xbf16, #tpu.memory_space<vmem>>, vector<1x2x16x4xbf16>
    %9 = vector.shape_cast %8 : vector<1x2x16x4xbf16> to vector<2x16x4xbf16>
    %c0_16 = arith.constant 0 : index
    %c0_17 = arith.constant 0 : index
    %c1_18 = arith.constant 1 : index
    %c0_19 = arith.constant 0 : index
    %10 = vector.load %arg3[%c0_16, %c0_17, %c1_18, %c0_19] : memref<1x2x18x4xbf16, #tpu.memory_space<vmem>>, vector<1x2x16x4xbf16>
    %11 = vector.shape_cast %10 : vector<1x2x16x4xbf16> to vector<2x16x4xbf16>
    %c0_20 = arith.constant 0 : index
    %c0_21 = arith.constant 0 : index
    %c2_22 = arith.constant 2 : index
    %c0_23 = arith.constant 0 : index
    %12 = vector.load %arg3[%c0_20, %c0_21, %c2_22, %c0_23] : memref<1x2x18x4xbf16, #tpu.memory_space<vmem>>, vector<1x2x16x4xbf16>
    %13 = vector.shape_cast %12 : vector<1x2x16x4xbf16> to vector<2x16x4xbf16>
    %14 = tpu.concatenate %9, %11, %13 in 2 : vector<2x16x4xbf16>, vector<2x16x4xbf16>, vector<2x16x4xbf16> -> vector<2x16x12xbf16>
    %c4 = arith.constant 4 : index
    %c0_24 = arith.constant 0 : index
    %c0_25 = arith.constant 0 : index
    %15 = vector.load %arg7[%c4, %c0_24, %c0_25] : memref<6x16x12xbf16, #tpu.memory_space<vmem>>, vector<2x16x12xbf16>
    tpu.vector_store %arg7[%c4, %c0_24, %c0_25], %14 {strides = array<i32>} : memref<6x16x12xbf16, #tpu.memory_space<vmem>>, vector<2x16x12xbf16>,
    %c0_26 = arith.constant 0 : index
    %c0_27 = arith.constant 0 : index
    %16 = vector.load %arg5[%c0_26, %c0_27] : memref<1x16xf32, #tpu.memory_space<vmem>>, vector<1x16xf32>
    %c0_28 = arith.constant 0 : index
    %c0_29 = arith.constant 0 : index
    %c0_30 = arith.constant 0 : index
    %17 = vector.load %arg7[%c0_28, %c0_29, %c0_30] : memref<6x16x12xbf16, #tpu.memory_space<vmem>>, vector<4x16x12xbf16>
    %18 = vector.shape_cast %17 : vector<4x16x12xbf16> to vector<64x12xbf16>
    %c1_31 = arith.constant 1 : index
    %c0_32 = arith.constant 0 : index
    %c0_33 = arith.constant 0 : index
    %19 = vector.load %arg7[%c1_31, %c0_32, %c0_33] : memref<6x16x12xbf16, #tpu.memory_space<vmem>>, vector<4x16x12xbf16>
    %20 = vector.shape_cast %19 : vector<4x16x12xbf16> to vector<64x12xbf16>
    %c0_34 = arith.constant 0 : index
    %c0_35 = arith.constant 0 : index
    %c0_36 = arith.constant 0 : index
    %c0_37 = arith.constant 0 : index
    %21 = vector.load %arg4[%c0_34, %c0_35, %c0_36, %c0_37] : memref<2x2x12x16xbf16, #tpu.memory_space<vmem>>, vector<1x1x12x16xbf16>
    %22 = vector.shape_cast %21 : vector<1x1x12x16xbf16> to vector<12x16xbf16>
    %cst = arith.constant dense<0.000000e+00> : vector<64x16xf32>
    %23 = tpu.matmul %18, %22, %cst {dimension_numbers = #tpu.dot_dimension_numbers<[1], [0], [0], [1], [0, 0, 1, 1], [], []>} : vector<64x12xbf16>, vector<12x16xbf16>, vector<64x16xf32> -> vector<64x16xf32>
    %c0_38 = arith.constant 0 : index
    %c1_39 = arith.constant 1 : index
    %c0_40 = arith.constant 0 : index
    %c0_41 = arith.constant 0 : index
    %24 = vector.load %arg4[%c0_38, %c1_39, %c0_40, %c0_41] : memref<2x2x12x16xbf16, #tpu.memory_space<vmem>>, vector<1x1x12x16xbf16>
    %25 = vector.shape_cast %24 : vector<1x1x12x16xbf16> to vector<12x16xbf16>
    %cst_42 = arith.constant dense<0.000000e+00> : vector<64x16xf32>
    %26 = tpu.matmul %20, %25, %cst_42 {dimension_numbers = #tpu.dot_dimension_numbers<[1], [0], [0], [1], [0, 0, 1, 1], [], []>} : vector<64x12xbf16>, vector<12x16xbf16>, vector<64x16xf32> -> vector<64x16xf32>
    %27 = arith.addf %23, %26 : vector<64x16xf32>
    %28 = vector.broadcast %16 : vector<1x16xf32> to vector<64x16xf32>
    %29 = arith.addf %27, %28 : vector<64x16xf32>
    %cst_43 = arith.constant 0.000000e+00 : f32
    %30 = vector.broadcast %cst_43 : f32 to vector<64x16xf32>
    %31 = arith.maximumf %29, %30 : vector<64x16xf32>
    %32 = vector.shape_cast %31 : vector<64x16xf32> to vector<4x16x16xf32>
    %33 = arith.truncf %32 : vector<4x16x16xf32> to vector<4x16x16xbf16>
    %c0_44 = arith.constant 0 : index
    %c0_45 = arith.constant 0 : index
    %c0_46 = arith.constant 0 : index
    %c0_47 = arith.constant 0 : index
    %c0_48 = arith.constant 0 : index
    %34 = vector.load %arg6[%c0_44, %c0_45, %c0_46, %c0_47, %c0_48] : memref<1x4x2x16x16xbf16, #tpu.memory_space<vmem>>, vector<1x4x1x16x16xbf16>
    %35 = vector.shape_cast %34 : vector<1x4x1x16x16xbf16> to vector<4x16x16xbf16>
    %36 = vector.shape_cast %33 : vector<4x16x16xbf16> to vector<1x4x1x16x16xbf16>
    tpu.vector_store %arg6[%c0_44, %c0_45, %c0_46, %c0_47, %c0_48], %36 {strides = array<i32>} : memref<1x4x2x16x16xbf16, #tpu.memory_space<vmem>>, vector<1x4x1x16x16xbf16>,
    %c1_49 = arith.constant 1 : index
    %c0_50 = arith.constant 0 : index
    %c0_51 = arith.constant 0 : index
    %37 = vector.load %arg7[%c1_49, %c0_50, %c0_51] : memref<6x16x12xbf16, #tpu.memory_space<vmem>>, vector<4x16x12xbf16>
    %38 = vector.shape_cast %37 : vector<4x16x12xbf16> to vector<64x12xbf16>
    %c2_52 = arith.constant 2 : index
    %c0_53 = arith.constant 0 : index
    %c0_54 = arith.constant 0 : index
    %39 = vector.load %arg7[%c2_52, %c0_53, %c0_54] : memref<6x16x12xbf16, #tpu.memory_space<vmem>>, vector<4x16x12xbf16>
    %40 = vector.shape_cast %39 : vector<4x16x12xbf16> to vector<64x12xbf16>
    %c1_55 = arith.constant 1 : index
    %c0_56 = arith.constant 0 : index
    %c0_57 = arith.constant 0 : index
    %c0_58 = arith.constant 0 : index
    %41 = vector.load %arg4[%c1_55, %c0_56, %c0_57, %c0_58] : memref<2x2x12x16xbf16, #tpu.memory_space<vmem>>, vector<1x1x12x16xbf16>
    %42 = vector.shape_cast %41 : vector<1x1x12x16xbf16> to vector<12x16xbf16>
    %cst_59 = arith.constant dense<0.000000e+00> : vector<64x16xf32>
    %43 = tpu.matmul %38, %42, %cst_59 {dimension_numbers = #tpu.dot_dimension_numbers<[1], [0], [0], [1], [0, 0, 1, 1], [], []>} : vector<64x12xbf16>, vector<12x16xbf16>, vector<64x16xf32> -> vector<64x16xf32>
    %c1_60 = arith.constant 1 : index
    %c1_61 = arith.constant 1 : index
    %c0_62 = arith.constant 0 : index
    %c0_63 = arith.constant 0 : index
    %44 = vector.load %arg4[%c1_60, %c1_61, %c0_62, %c0_63] : memref<2x2x12x16xbf16, #tpu.memory_space<vmem>>, vector<1x1x12x16xbf16>
    %45 = vector.shape_cast %44 : vector<1x1x12x16xbf16> to vector<12x16xbf16>
    %cst_64 = arith.constant dense<0.000000e+00> : vector<64x16xf32>
    %46 = tpu.matmul %40, %45, %cst_64 {dimension_numbers = #tpu.dot_dimension_numbers<[1], [0], [0], [1], [0, 0, 1, 1], [], []>} : vector<64x12xbf16>, vector<12x16xbf16>, vector<64x16xf32> -> vector<64x16xf32>
    %47 = arith.addf %43, %46 : vector<64x16xf32>
    %48 = vector.broadcast %16 : vector<1x16xf32> to vector<64x16xf32>
    %49 = arith.addf %47, %48 : vector<64x16xf32>
    %cst_65 = arith.constant 0.000000e+00 : f32
    %50 = vector.broadcast %cst_65 : f32 to vector<64x16xf32>
    %51 = arith.maximumf %49, %50 : vector<64x16xf32>
    %52 = vector.shape_cast %51 : vector<64x16xf32> to vector<4x16x16xf32>
    %53 = arith.truncf %52 : vector<4x16x16xf32> to vector<4x16x16xbf16>
    %c0_66 = arith.constant 0 : index
    %c0_67 = arith.constant 0 : index
    %c1_68 = arith.constant 1 : index
    %c0_69 = arith.constant 0 : index
    %c0_70 = arith.constant 0 : index
    %54 = vector.load %arg6[%c0_66, %c0_67, %c1_68, %c0_69, %c0_70] : memref<1x4x2x16x16xbf16, #tpu.memory_space<vmem>>, vector<1x4x1x16x16xbf16>
    %55 = vector.shape_cast %54 : vector<1x4x1x16x16xbf16> to vector<4x16x16xbf16>
    %56 = vector.shape_cast %53 : vector<4x16x16xbf16> to vector<1x4x1x16x16xbf16>
    tpu.vector_store %arg6[%c0_66, %c0_67, %c1_68, %c0_69, %c0_70], %56 {strides = array<i32>} : memref<1x4x2x16x16xbf16, #tpu.memory_space<vmem>>, vector<1x4x1x16x16xbf16>,
    return
  }
  func.func @transform_0(%arg0: i32, %arg1: i32) -> (i32, i32, i32, i32) {
    %c0_i32 = arith.constant 0 : i32
    %c0_i32_0 = arith.constant 0 : i32
    %c0_i32_1 = arith.constant 0 : i32
    return %arg0, %arg1, %c0_i32, %c0_i32_0 : i32, i32, i32, i32
  }
  func.func @transform_1(%arg0: i32, %arg1: i32) -> (i32, i32, i32, i32) {
    %c1_i32 = arith.constant 1 : i32
    %0 = arith.addi %arg1, %c1_i32 : i32
    %c2_i32 = arith.constant 2 : i32
    %1 = arith.muli %0, %c2_i32 : i32
    %c0_i32 = arith.constant 0 : i32
    %c0_i32_0 = arith.constant 0 : i32
    %c0_i32_1 = arith.constant 0 : i32
    return %arg0, %1, %c0_i32, %c0_i32_0 : i32, i32, i32, i32
  }
  func.func @transform_2(%arg0: i32, %arg1: i32) -> (i32, i32, i32, i32) {
    %c0_i32 = arith.constant 0 : i32
    %c0_i32_0 = arith.constant 0 : i32
    %c0_i32_1 = arith.constant 0 : i32
    %c0_i32_2 = arith.constant 0 : i32
    %c0_i32_3 = arith.constant 0 : i32
    return %c0_i32, %c0_i32_0, %c0_i32_1, %c0_i32_2 : i32, i32, i32, i32
  }
  func.func @transform_3(%arg0: i32, %arg1: i32) -> (i32, i32) {
    %c0_i32 = arith.constant 0 : i32
    %c0_i32_0 = arith.constant 0 : i32
    %c0_i32_1 = arith.constant 0 : i32
    return %c0_i32, %c0_i32_0 : i32, i32
  }
  func.func @transform_4(%arg0: i32, %arg1: i32) -> (i32, i32, i32, i32, i32) {
    %c0_i32 = arith.constant 0 : i32
    %c0_i32_0 = arith.constant 0 : i32
    %c0_i32_1 = arith.constant 0 : i32
    %c0_i32_2 = arith.constant 0 : i32
    return %arg0, %arg1, %c0_i32, %c0_i32_0, %c0_i32_1 : i32, i32, i32, i32, i32
  }
}

</mosaic_0001>

<bundles_post_ra>
// kernel: tpu_custom_call.1
= control target key start
LH: loop header
LB: loop body
LE: loop exit
PB: predicated region body
PF: predicated region fallthrough
CT: control target
= control target key end

     0   :  { %9 = vsyncpa [#allocation4], 0  ;;  %s2113_s0 = inlined_call_operand.vmem [shape: bf16[2,18,18,4], index: 0, kind: input, shape index: {}]   ;;  %s2114_s1 = inlined_call_operand.vmem [shape: bf16[2,18,18,4], index: 1, kind: input, shape index: {}]   ;;  %s2115_s2 = inlined_call_operand.vmem [shape: bf16[2,2,12,16], index: 2, kind: input, shape index: {}]   ;;  %s2116_s3 = inlined_call_operand.vmem [shape: f32[1,16], index: 3, kind: input, shape index: {}]   ;;  %s2117_s4 = inlined_call_operand.hbm [shape: bf16[2,16,2,16,16], index: 4, kind: output, shape index: {}]  }
   0x1   :  { %11 = vsyncpa [#allocation4 + $0x1], 0  ;;  %s1753_s15 = smov 0   ;;  %s1755_s16 = smov 0  }
   0x2   :  { %s1757_s17 = smov 0   ;;  %s1759_s18 = smov 0  }
   0x3   :  { %s1761_s19 = smov 0   ;;  %s1763_s20 = smov 0  }
   0x4   :  { %s1765_s21 = smov 0   ;;  %s1767_s22 = smov 0  }
   0x5 LB: > { %s1308_s23 = sadd.s32 4294967295, %s1722_s22   ;;  %s1309_s24 = sadd.s32 4294967294, %s1722_s22   ;;  %s1722_s22 = sphi %s1767_s22, %s17_s22   ;;  %s1718_s21 = sphi %s1765_s21, %s2126_s21   ;;  %s1714_s20 = sphi %s1763_s20, %s2125_s20   ;;  %s1710_s19 = sphi %s1761_s19, %s2124_s19   ;;  %s1706_s18 = sphi %s1759_s18, %s2123_s18   ;;  %s1702_s17 = sphi %s1757_s17, %s2122_s17   ;;  %s1698_s16 = sphi %s1755_s16, %s2121_s16   ;;  %s1694_s15 = sphi %s1753_s15, %s2120_s15  }
   0x6   : > { %s26_s25 = sadd.s32 1, %s1714_s20  ;;  %s29_s26 = sadd.s32 1, %s1718_s21 }
   0x7   : > { %p27_p0 = scmp.ge.s32.totalorder %s26_s25, 4  ;;  %p150_p1 = scmp.ne.s32.totalorder %s1702_s17, %s1698_s16 }
   0x8   : > { %p151_p2 = scmp.eq.s32.totalorder %s1308_s23, 7  ;;  %p156_p5 = scmp.ne.s32.totalorder %s1698_s16, %s1694_s15 }
   0x9   : > { %s2128_s25 = smov (%p27_p0, %s26_s25), 0  ;;  %s2130_s26 = smov (!%p27_p0, %s29_s26), %s1718_s21 }
   0xa   : > { %s136_s27 = ssub.s32 %s1714_s20, %s2128_s25  ;;  %p1804_p3 = por %p151_p2, %p150_p1 }
   0xb   : > { %p31_p4 = scmp.ge.s32.totalorder %s2130_s26, 2  ;;  %p157_p6 = scmp.eq.s32.totalorder %s1309_s24, 7 }
   0xc   : > { %p1314_p7 = scmp.ge.s32.totalorder %s1722_s22, 1  ;;  %p223_p9 = scmp.lt.s32.totalorder %s1722_s22, 9 }
   0xd   : > { %s2132_s26 = smov (%p31_p4, %s2130_s26), 0  ;;  %p1813_p8 = por %p157_p6, %p156_p5 }
   0xe   : > { %s135_s30 = ssub.s32 %s1718_s21, %s2132_s26  ;;  %s140_s5 = sadd.s32 1, %s1702_s17 }
   0xf   : > { %s137_s6 = sor.u32 %s136_s27, %s135_s30  ;;  %p224_p10 = pnand %p1314_p7, %p223_p9 }
  0x10   : > { %p138_p11 = scmp.eq.s32.totalorder %s137_s6, 0  ;;  %s1316_s8 = sshll.u32 (!%p224_p10), %s1706_s18, 2 }
  0x11   : > { %227 = sbr.rel (%p224_p10) target bundleno = 421 (0x1a5), region = 36  ;;  %p277_p12 = scmp.lt.s32.totalorder (!%p224_p10), %s1710_s19, 1 }
  0x12   : > { %s1822_s7 = scalar_select %p138_p11, %s1702_s17, %s140_s5  }
  0x13   : > { %p279_p13 = scmp.lt.s32.totalorder (!%p224_p10), %s1316_s8, 17  ;;  %s1450_s13 = sadd.s32 (!%p224_p10), 4, %s1316_s8 }
  0x14   : > { %p297_p0 = scmp.lt.s32.totalorder (!%p224_p10), %s1450_s13, 17  ;;  %s1724_s6 = smov (!%p224_p10), 8  }
  0x15   : > { %s1421_s24 = sshll.u32 (!%p224_p10), %s1710_s19, 6 }
  0x16   : > { %s1827_s9 = scalar_select %p277_p12, %s1710_s19, 1  ;;  %vm426_vm0 = vcmask 1046528   ;;  %vm357_vm1 = vsmask.f32 7424  ;;  %vm658_vm2 = vcmask 1045504   ;;  %vm447_vm3 = vcmask 31744  }
  0x17   : > { %s280_s10 = scalar_select %p279_p13, %s1316_s8, 17  ;;  %vm456_vm4 = vcmask 64512   ;;  %vm493_vm5 = vcmask 93184   ;;  %vm645_vm6 = vcmask 97280   ;;  %vm886_vm7 = vcmask 125952  }
  0x18   : > { %s1516_s11 = smul.u32 54, %s1827_s9  ;;  %s2134_s13 = smov (!%p297_p0, %s1450_s13), 17 }
  0x19   : > { %s1515_s12 = smul.u32 3, %s280_s10 }
  0x1a   : > { %s1517_s5 = smul.u32 3, %s2134_s13  ;;  %s1726_s13 = smov [#allocation3]  }
  0x1b   : > { %s283_s14 = sadd.s32 %s1516_s11, %s1515_s12 }
  0x1c   : > { %s1317_s23 = sshll.u32 %s283_s14, 2  ;;  %s301_s8 = sadd.s32 %s1517_s5, %s1516_s11 }
  0x1d   : > { %s1835_s30 = scalar_lea.vmem %s2113_s0, %s1317_s23  ;;  %s1320_s10 = sshll.u32 %s301_s8, 2 }
  0x1e   : > { %v310_v0 = vld [vmem:[%s1835_s30 + $0x4] sm:$0xf]  ;;  %v321_v1 = vld [vmem:[%s1835_s30] sm:$0xe]  ;;  %v313_v6 = vld [vmem:[%s1835_s30 + $0x18] sm:$0xf]  ;;  %s1873_s9 = scalar_lea.vmem %s2114_s1, %s1320_s10 }
  0x1f   : > { %v1592_v2 = vld [vmem:[%s1835_s30 + $0x8] ss:$0 sps:$4 sm:$0x11]   ;;  %v1329_v3 = vcombine.low %v321_v1, %v310_v0  ;;  %v309_v4 = vld [vmem:[%s1835_s30] sm:$0xf]  ;;  %s1725_s11 = smov 4  }
  0x20   : > { %v1843_v5 = vcombine.low %v309_v4, %v310_v0  ;;  %v314_v7 = vld [vmem:[%s1835_s30 + $0x1c] sm:$0xf]  ;;  %v428_v9 = vrot.slane %v1592_v2, 1  ;;  %v366_v10 = vshll.u32 %v1592_v2, 16  ;;  %v311_v15 = vld [vmem:[%s1835_s30 + $0xc] sm:$0xf] }
  0x21   : > { %v427_v8 = vrot.slane %v1329_v3, 1  ;;  %v1847_v11 = vcombine.low %v313_v6, %v314_v7  ;;  %v1596_v12 = vld [vmem:[%s1835_s30 + $0x20] ss:$0 sps:$4 sm:$0x11]   ;;  %v312_v16 = vld [vmem:[%s1835_s30 + $0x10] sm:$0xf] }
  0x22   : > { %v359_v13 = vshrl.u32 %v1843_v5, 16  ;;  %v361_v14 = vshll.u32 %v1843_v5, 16  ;;  %v368_v21 = vrot.slane %v366_v10, 1  ;;  %v390_v22 = vshll.u32 %v1596_v12, 16  ;;  %v323_v26 = vld [vmem:[%s1835_s30 + $0x18] sm:$0xe] }
  0x23   : > { %v429_v17 = vsel %vm426_vm0, %v427_v8, %v428_v9  ;;  %v383_v18 = vshrl.u32 %v1847_v11, 16  ;;  %v385_v19 = vshll.u32 %v1847_v11, 16  ;;  %v1859_v23 = vcombine.low %v311_v15, %v312_v16  ;;  %v1598_v24 = vld [vmem:[%s1835_s30 + $0x14] ss:$0 sps:$4 sm:$0x11]   ;;  %s1448_s23 = sshll.u32 %s1706_s18, 4 }
  0x24   : > { %439 = vrot.lane.b32.xlu1 %v429_v17, %s1724_s6  ;;  %v363_v20 = vrot.slane %v361_v14, 1  ;;  %v434_v27 = vrot.slane %v1596_v12, 1  ;;  %v322_v28 = vld [vmem:[%s1835_s30 + $0xc] sm:$0xe]  ;;  %v392_v30 = vrot.slane %v390_v22, 1  ;;  %v378_v35 = vshll.u32 %v1598_v24, 16  ;;  %s1199_s18 = sadd.s32 %s1448_s23, %s1421_s24 }
  0x25   : > { %v387_v25 = vrot.slane %v385_v19, 1  ;;  %v371_v31 = vshrl.u32 %v1859_v23, 16  ;;  %v373_v32 = vshll.u32 %v1859_v23, 16  ;;  %v315_v33 = vld [vmem:[%s1835_s30 + $0x24] sm:$0xf]  ;;  %v1331_v36 = vcombine.low %v323_v26, %v314_v7  ;;  %s1422_s27 = sshll.u32 %s1199_s18, 6 }
  0x26   : > { %v364_v29 = vor.u32 %v363_v20, %v359_v13  ;;  %v1330_v37 = vcombine.low %v322_v28, %v312_v16  ;;  %v316_v38 = vld [vmem:[%s1835_s30 + $0x28] sm:$0xf]  ;;  %v431_v41 = vrot.slane %v1598_v24, 1  ;;  %v1602_v43 = vld [vmem:[%s1835_s30 + $0x2c] ss:$0 sps:$4 sm:$0x11]   ;;  %s2055_s8 = scalar_lea.hbm %s2117_s4, %s1422_s27 }
  0x27   : > { %v388_v34 = vor.u32 %v387_v25, %v383_v18  ;;  %v375_v40 = vrot.slane %v373_v32, 1  ;;  %v1876_v42 = vcombine.low %v315_v33, %v316_v38  ;;  %v380_v45 = vrot.slane %v378_v35, 1  ;;  %v324_v48 = vld [vmem:[%s1835_s30 + $0x24] sm:$0xe]  ;;  %v502_v53 = vld [vmem:[%s1873_s9] sm:$0xf] }
  0x28   : > { %v369_v39 = vsel %vm357_vm1, %v364_v29, %v368_v21  ;;  %v433_v46 = vrot.slane %v1331_v36, 1  ;;  %v430_v47 = vrot.slane %v1330_v37, 1  ;;  %v402_v52 = vshll.u32 %v1602_v43, 16  ;;  %v503_v57 = vld [vmem:[%s1873_s9 + $0x4] sm:$0xf] }
  0x29   : > { %406 = vrot.lane.b32.xlu0 %v369_v39, %s1725_s11  ;;  %v393_v44 = vsel %vm357_vm1, %v388_v34, %v392_v30  ;;  %v376_v49 = vor.u32 %v375_v40, %v371_v31  ;;  %v395_v50 = vshrl.u32 %v1876_v42, 16  ;;  %v397_v51 = vshll.u32 %v1876_v42, 16  ;;  %v1605_v62 = vld [vmem:[%s1873_s9 + $0x8] ss:$0 sps:$4 sm:$0x11]  }
  0x2a   : > { %410 = vrot.lane.b32.xlu1 %v393_v44, %s1725_s11  ;;  %v435_v54 = vsel %vm426_vm0, %v433_v46, %v434_v27  ;;  %v1332_v55 = vcombine.low %v324_v48, %v316_v38  ;;  %v437_v56 = vrot.slane %v1602_v43, 1  ;;  %v404_v60 = vrot.slane %v402_v52, 1  ;;  %v508_v1 = vld [vmem:[%s1873_s9] sm:$0xe]  ;;  %v504_v2 = vld [vmem:[%s1873_s9 + $0xc] sm:$0xf] }
  0x2b   : > { %v381_v58 = vsel %vm357_vm1, %v376_v49, %v380_v45  ;;  %v399_v59 = vrot.slane %v397_v51, 1  ;;  %v1889_v61 = vcombine.low %v502_v53, %v503_v57  ;;  %v432_v63 = vsel %vm426_vm0, %v430_v47, %v431_v41  ;;  %v505_v8 = vld [vmem:[%s1873_s9 + $0x10] sm:$0xf]  ;;  %v1608_v14 = vld [vmem:[%s1873_s9 + $0x14] ss:$0 sps:$4 sm:$0x11]  }
  0x2c   : > { %v436_v0 = vrot.slane %v1332_v55, 1  ;;  %v534_v7 = vshll.u32 %v1605_v62, 16  ;;  %v1345_v10 = vcombine.low %v508_v1, %v503_v57  ;;  %v561_v12 = vrot.slane %v1605_v62, 1  ;;  %v509_v17 = vld [vmem:[%s1873_s9 + $0xc] sm:$0xe] }
  0x2d   : > { %408 = vrot.lane.b32.xlu0 %v381_v58, %s1725_s11  ;;  %v400_v3 = vor.u32 %v399_v59, %v395_v50  ;;  %v527_v4 = vshrl.u32 %v1889_v61, 16  ;;  %v529_v6 = vshll.u32 %v1889_v61, 16  ;;  %v1901_v13 = vcombine.low %v504_v2, %v505_v8  ;;  %v1611_v18 = vld [vmem:[%s2115_s2 + $0x8] sm:$0x3f]   ;;  %v1612_v24 = vld [vmem:[%s2115_s2] sm:$0x3f]  }
  0x2e   : > { %443 = vrot.lane.b32.xlu1 %v435_v54, %s1724_s6  ;;  %v438_v9 = vsel %vm426_vm0, %v436_v0, %v437_v56  ;;  %v536_v19 = vrot.slane %v534_v7, 1  ;;  %v560_v20 = vrot.slane %v1345_v10, 1  ;;  %v546_v26 = vshll.u32 %v1608_v14, 16  ;;  %v1615_v28 = vld [vmem:[%s2115_s2 + $0x18] sm:$0x3f]   ;;  %1511 = vmatprep.subr.msk.bf16.mxu0 %vm658_vm2, %v1611_v18 }
  0x2f   : > { %v405_v15 = vsel %vm357_vm1, %v400_v3, %v404_v60  ;;  %v531_v16 = vrot.slane %v529_v6, 1  ;;  %v539_v21 = vshrl.u32 %v1901_v13, 16  ;;  %v541_v22 = vshll.u32 %v1901_v13, 16  ;;  %v1616_v29 = vld [vmem:[%s2115_s2 + $0x10] sm:$0x3f]   ;;  %1512 = vmatprep.subr.msk.bf16.mxu1 %vm658_vm2, %v1612_v24 }
  0x30   : > { %v1346_v27 = vcombine.low %v509_v17, %v505_v8  ;;  %v562_v30 = vsel %vm426_vm0, %v560_v20, %v561_v12  ;;  %v564_v32 = vrot.slane %v1608_v14, 1  ;;  %v660_v33 = vsel %vm658_vm2, %v1611_v18, 0 }
  0x31   : > { %441 = vrot.lane.b32.xlu0 %v432_v63, %s1724_s6  ;;  %v532_v25 = vor.u32 %v531_v16, %v527_v4  ;;  %v543_v31 = vrot.slane %v541_v22, 1  ;;  %1472 = vmatpush3.bf16.msra.mxu0 %v660_v33  ;;  %v765_v35 = vsel %vm658_vm2, %v1612_v24, 0  ;;  %v1928_v36 = vsel %vm658_vm2, %v1615_v28, 0 }
  0x32   : > { %445 = vrot.lane.b32.xlu1 %v438_v9, %s1724_s6  ;;  %v563_v34 = vrot.slane %v1346_v27, 1  ;;  %1482 = vmatpush3.bf16.msra.mxu1 %v765_v35  ;;  %v1932_v37 = vsel %vm658_vm2, %v1616_v29, 0  ;;  %v548_v40 = vrot.slane %v546_v26, 1 }
  0x33   : > { %v537_v38 = vsel %vm357_vm1, %v532_v25, %v536_v19  ;;  %v544_v39 = vor.u32 %v543_v31, %v539_v21  ;;  %1513 = vmatprep.subr.msk.bf16.mxu0 %vm658_vm2, %v1615_v28  ;;  %1514 = vmatprep.subr.msk.bf16.mxu1 %vm658_vm2, %v1616_v29 }
  0x34   : > { %v565_v41 = vsel %vm426_vm0, %v563_v34, %v564_v32  ;;  %v1995_v32 = vld [vmem:[%s2116_s3] ss:$0 sm:$0xff] }
  0x35   : > { %412 = vrot.lane.b32.xlu0 %v405_v15, %s1725_s11  ;;  %v549_v43 = vsel %vm357_vm1, %v544_v39, %v548_v40 }
  0x36   : > { %566 = vrot.lane.b32.xlu1 %v562_v30, %s1724_s6 }
  0x39   : > { %550 = vrot.lane.b32.xlu0 %v537_v38, %s1725_s11 }
  0x3a   : > { %568 = vrot.lane.b32.xlu1 %v565_v41, %s1724_s6  ;;  %s268_s6 = sand.u32 1, %s1698_s16  }
  0x3b   : > { %s1315_s9 = sshll.u32 %s268_s6, 6  ;;  %s2061_s10 = scalar_lea.sflag [#allocation4], %s268_s6 }
  0x3c   : > { %s2002_s14 = scalar_lea.vmem [#allocation3], %s1315_s9  ;;  %s1634_s9 = sshll.u32 %s1726_s13, 4  ;;  %s1635_s9 = int_to_ptr.vmem [resolvable:$false] %s1634_s9 }
  0x3d   : > { %552 = vrot.lane.b32.xlu0 %v549_v43, %s1725_s11  ;;  %s1202_s19 = sshll.u32 %s2002_s14, 4  ;;  %s1636_s23 = scalar_lea.vmem %s1635_s9, 2048  ;;  %s2048_s19 = int_to_ptr.vmem [resolvable:$true] %s1202_s19 }
  0x3e   : > { %s1630_s12 = scalar_lea.vmem %s2048_s19, 1024  ;;  %p1637_p5 = scmp.lt.s32.totalorder %s2048_s19, %s1635_s9 }
  0x3f   : > { %p1631_p1 = scmp.ne.s32.totalorder %s2048_s19, %s1630_s12  ;;  %p1638_p6 = scmp.lt.s32.totalorder %s1636_s23, %s1630_s12 }
  0x41   : > { %p1632_p2 = pnand %p1631_p1, %p1804_p3  ;;  %p1639_p7 = por %p1638_p6, %p1637_p5 }
  0x43   : > { %p1633_p4 = pneg %p1632_p2 }
  0x45   : > { %p1640_p9 = pnand %p1639_p7, %p1633_p4 }
  0x96   : > { %v440_v44 = vpop.permute.xlu1 %439 }
  0x9b   : > { %v407_v45 = vpop.permute.xlu0 %406 }
  0x9c   : > { %v449_v46 = vsel %vm447_vm3, %v1843_v5, %v407_v45  ;;  %v411_v47 = vpop.permute.xlu1 %410 }
  0x9d   : > { %v458_v48 = vsel %vm456_vm4, %v449_v46, %v440_v44  ;;  %v453_v51 = vsel %vm447_vm3, %v1847_v11, %v411_v47 }
  0x9e   : > { %v1333_v49 = vcombine.low %v458_v48, %v458_v48  ;;  %v1334_v50 = vcombine.high %v458_v48, %v458_v48 }
  0x9f   : > { %v409_v52 = vpop.permute.xlu0 %408 }
  0xa0   : > { %494 = vst.msk [vmem:[#allocation2] sm:$0xf] %vm493_vm5, %v1333_v49  ;;  %495 = vst.msk [vmem:[#allocation2 + $0x4] sm:$0xf] %vm493_vm5, %v1334_v50  ;;  %v444_v53 = vpop.permute.xlu1 %443  ;;  %v451_v5 = vsel %vm447_vm3, %v1859_v23, %v409_v52 }
  0xa1   : > { %v462_v54 = vsel %vm456_vm4, %v453_v51, %v444_v53 }
  0xa2   : > { %v1337_v55 = vcombine.low %v462_v54, %v462_v54  ;;  %v1338_v56 = vcombine.high %v462_v54, %v462_v54 }
  0xa3   : > { %v442_v57 = vpop.permute.xlu0 %441 }
  0xa4   : > { %498 = vst.msk [vmem:[#allocation2 + $0x10] sm:$0xf] %vm493_vm5, %v1337_v55  ;;  %499 = vst.msk [vmem:[#allocation2 + $0x14] sm:$0xf] %vm493_vm5, %v1338_v56  ;;  %v460_v11 = vsel %vm456_vm4, %v451_v5, %v442_v57  ;;  %v446_v58 = vpop.permute.xlu1 %445 }
  0xa5   : > { %v1335_v59 = vcombine.low %v460_v11, %v460_v11  ;;  %v1336_v60 = vcombine.high %v460_v11, %v460_v11 }
  0xa7   : > { %496 = vst.msk [vmem:[#allocation2 + $0x8] sm:$0xf] %vm493_vm5, %v1335_v59  ;;  %497 = vst.msk [vmem:[#allocation2 + $0xc] sm:$0xf] %vm493_vm5, %v1336_v60  ;;  %v413_v62 = vpop.permute.xlu0 %412  ;;  %v1610_v63 = vld [vmem:[#allocation2] sm:$0xff]  }
  0xa8   : > { %v455_v23 = vsel %vm447_vm3, %v1876_v42, %v413_v62  ;;  %1483 = vmatprep.mubr.msk.bf16.mxu1 %vm645_vm6, %v1610_v63  ;;  %v567_v3 = vpop.permute.xlu1 %566 }
  0xa9   : > { %v464_v0 = vsel %vm456_vm4, %v455_v23, %v446_v58 }
  0xaa   : > { %v1339_v1 = vcombine.low %v464_v0, %v464_v0  ;;  %v1340_v2 = vcombine.high %v464_v0, %v464_v0 }
  0xab   : > { %v551_v4 = vpop.permute.xlu0 %550  ;;  %v1617_v8 = vld [vmem:[#allocation2 + $0x10] sm:$0xff]  }
  0xac   : > { %500 = vst.msk [vmem:[#allocation2 + $0x18] sm:$0xf] %vm493_vm5, %v1339_v1  ;;  %501 = vst.msk [vmem:[#allocation2 + $0x1c] sm:$0xf] %vm493_vm5, %v1340_v2  ;;  %v571_v6 = vsel %vm447_vm3, %v1889_v61, %v551_v4  ;;  %v569_v12 = vpop.permute.xlu1 %568  ;;  %v1618_v16 = vld [vmem:[#allocation2 + $0x10] sm:$0xff]  }
  0xad   : > { %v575_v7 = vsel %vm456_vm4, %v571_v6, %v567_v3  ;;  %v1623_v21 = vld [vmem:[#allocation2 + $0x10] sm:$0xff]  }
  0xae   : > { %v1347_v9 = vcombine.low %v575_v7, %v575_v7  ;;  %v1348_v42 = vcombine.high %v575_v7, %v575_v7  ;;  %v1613_v10 = vld [vmem:[#allocation2 + $0x8] sm:$0xff]   ;;  %v1624_v25 = vld [vmem:[#allocation2 + $0x10] sm:$0xff]  }
  0xaf   : > { %v1614_v14 = vld [vmem:[#allocation2 + $0x8] sm:$0xff]   ;;  %v553_v15 = vpop.permute.xlu0 %552  ;;  %1473 = vmatprep.mubr.msk.bf16.mxu0 %vm645_vm6, %v1613_v10 }
  0xb0   : > { %593 = vst.msk [vmem:[#allocation2 + $0x20] sm:$0xf] %vm493_vm5, %v1347_v9  ;;  %594 = vst.msk [vmem:[#allocation2 + $0x24] sm:$0xf] %vm493_vm5, %v1348_v42  ;;  %v573_v17 = vsel %vm447_vm3, %v1901_v13, %v553_v15  ;;  %1484 = vmatmul.mubr.msk.bf16.vlgmr.msra.gmra.mxu1 %vm645_vm6, %v1614_v14  ;;  %1474 = vmatmul.mubr.msk.bf16.vlgmr.msra.gmra.mxu0 %vm645_vm6, %v1617_v8  ;;  %v1622_v24 = vld [vmem:[#allocation2 + $0x8] sm:$0xff]  }
  0xb1   : > { %v577_v61 = vsel %vm456_vm4, %v573_v17, %v569_v12  ;;  %1487 = vmatprep.mubr.msk.bf16.mxu1 %vm645_vm6, %v1618_v16  ;;  %1492 = vmatpush3.bf16.msra.mxu0 %v1928_v36 }
  0xb2   : > { %v1349_v18 = vcombine.low %v577_v61, %v577_v61  ;;  %v1350_v19 = vcombine.high %v577_v61, %v577_v61  ;;  %1502 = vmatpush3.bf16.msra.mxu1 %v1932_v37 }
  0xb3   : > { %v1619_v20 = vld [vmem:[#allocation2 + $0x18] sm:$0xff]  }
  0xb4   : > { %595 = vst.msk [vmem:[#allocation2 + $0x28] sm:$0xf] %vm493_vm5, %v1349_v18  ;;  %596 = vst.msk [vmem:[#allocation2 + $0x2c] sm:$0xf] %vm493_vm5, %v1350_v19  ;;  %1477 = vmatprep.mubr.msk.bf16.mxu0 %vm645_vm6, %v1619_v20  ;;  %v1620_v13 = vld [vmem:[#allocation2 + $0x18] sm:$0xff]  }
  0xb5   : > { %v1625_v26 = vld [vmem:[#allocation2 + $0x18] sm:$0xff]  }
  0xb6   : > { %v1626_v27 = vld [vmem:[#allocation2 + $0x18] sm:$0xff]  }
  0xb7   : > { %v1621_v22 = vld [vmem:[#allocation2 + $0x20] sm:$0xff]  }
  0xb8   : > { %1488 = vmatmul.mubr.msk.bf16.gmra.mxu1 %vm645_vm6, %v1620_v13  ;;  %1478 = vmatmul.mubr.msk.bf16.gmra.mxu0 %vm645_vm6, %v1621_v22  ;;  %v1627_v28 = vld [vmem:[#allocation2 + $0x20] sm:$0xff]  }
  0xb9   : > { %1503 = vmatprep.mubr.msk.bf16.mxu1 %vm645_vm6, %v1622_v24  ;;  %1493 = vmatprep.mubr.msk.bf16.mxu0 %vm645_vm6, %v1623_v21  ;;  %v1628_v30 = vld [vmem:[#allocation2 + $0x20] sm:$0xff]  }
  0xbb   : > { %v1629_v29 = vld [vmem:[#allocation2 + $0x28] sm:$0xff]  }
  0xc0   : > { %1504 = vmatmul.mubr.msk.bf16.vlgmr.msra.gmra.mxu1 %vm645_vm6, %v1624_v25  ;;  %1494 = vmatmul.mubr.msk.bf16.vlgmr.msra.gmra.mxu0 %vm645_vm6, %v1625_v26 }
  0xc1   : > { %1507 = vmatprep.mubr.msk.bf16.mxu1 %vm645_vm6, %v1626_v27  ;;  %1497 = vmatprep.mubr.msk.bf16.mxu0 %vm645_vm6, %v1627_v28 }
  0xc8   : > { %1508 = vmatmul.mubr.msk.bf16.gmra.mxu1 %vm645_vm6, %v1628_v30  ;;  %1498 = vmatmul.mubr.msk.bf16.gmra.mxu0 %vm645_vm6, %v1629_v29 }
 0x170   : > { %v1485_v31 = vpop.f32.mrf.mxu1  ;;  %v1475_v33 = vpop.f32.mrf.mxu0 }
 0x171   : > { %v810_v34 = vadd.f32 %v1485_v31, %v1475_v33 }
 0x172   : > { %v801_v35 = vpop.f32.mrf.mxu1  ;;  %v696_v36 = vpop.f32.mrf.mxu0 }
 0x173   : > { %v840_v37 = vadd.f32 %v1995_v32, %v810_v34  ;;  %v802_v38 = vadd.f32 %v801_v35, %v696_v36 }
 0x174   : > { %v1486_v39 = vpop.f32.mrf.mxu1  ;;  %v1476_v40 = vpop.f32.mrf.mxu0 }
 0x175   : > { %v848_v41 = vmax.f32 %v840_v37, 0.0  ;;  %v838_v43 = vadd.f32 %v1995_v32, %v802_v38  ;;  %v813_v44 = vadd.f32 %v1486_v39, %v1476_v40 }
 0x176   : > { %v804_v45 = vpop.f32.mrf.mxu1  ;;  %v699_v46 = vpop.f32.mrf.mxu0 }
 0x177   : > { %v1434_v47 = vpack.c.bf16 %v848_v41, %v848_v41  ;;  %v846_v48 = vmax.f32 %v838_v43, 0.0  ;;  %v841_v49 = vadd.f32 %v1995_v32, %v813_v44  ;;  %v805_v50 = vadd.f32 %v804_v45, %v699_v46 }
 0x178   : > { %v1489_v51 = vpop.f32.mrf.mxu1  ;;  %v1479_v52 = vpop.f32.mrf.mxu0 }
 0x179   : > { %889 = vst.msk [vmem:[%s2002_s14 + $0x10] sm:$0xf] %vm886_vm7, %v1434_v47  ;;  %v1432_v53 = vpack.c.bf16 %v846_v48, %v846_v48  ;;  %v849_v54 = vmax.f32 %v841_v49, 0.0  ;;  %v839_v55 = vadd.f32 %v1995_v32, %v805_v50  ;;  %v826_v56 = vadd.f32 %v1489_v51, %v1479_v52 }
 0x17a   : > { %v817_v5 = vpop.f32.mrf.mxu1  ;;  %v712_v57 = vpop.f32.mrf.mxu0 }
 0x17b   : > { %887 = vst.msk [vmem:[%s2002_s14] sm:$0xf] %vm886_vm7, %v1432_v53  ;;  %v1435_v11 = vpack.c.bf16 %v849_v54, %v849_v54  ;;  %v847_v58 = vmax.f32 %v839_v55, 0.0  ;;  %v844_v59 = vadd.f32 %v1995_v32, %v826_v56  ;;  %v818_v60 = vadd.f32 %v817_v5, %v712_v57 }
 0x17c   : > { %v1490_v62 = vpop.f32.mrf.mxu1  ;;  %v1480_v63 = vpop.f32.mrf.mxu0 }
 0x17d   : > { %890 = vst.msk [vmem:[%s2002_s14 + $0x14] sm:$0xf] %vm886_vm7, %v1435_v11  ;;  %v1433_v23 = vpack.c.bf16 %v847_v58, %v847_v58  ;;  %v852_v0 = vmax.f32 %v844_v59, 0.0  ;;  %v842_v1 = vadd.f32 %v1995_v32, %v818_v60  ;;  %v829_v2 = vadd.f32 %v1490_v62, %v1480_v63 }
 0x17e   : > { %v820_v3 = vpop.f32.mrf.mxu1  ;;  %v715_v4 = vpop.f32.mrf.mxu0 }
 0x17f   : > { %888 = vst.msk [vmem:[%s2002_s14 + $0x4] sm:$0xf] %vm886_vm7, %v1433_v23  ;;  %v1438_v6 = vpack.c.bf16 %v852_v0, %v852_v0  ;;  %v850_v7 = vmax.f32 %v842_v1, 0.0  ;;  %v845_v8 = vadd.f32 %v1995_v32, %v829_v2  ;;  %v821_v9 = vadd.f32 %v820_v3, %v715_v4 }
 0x180   : > { %v1505_v42 = vpop.f32.mrf.mxu1  ;;  %v1495_v10 = vpop.f32.mrf.mxu0 }
 0x181   : > { %893 = vst.msk [vmem:[%s2002_s14 + $0x30] sm:$0xf] %vm886_vm7, %v1438_v6  ;;  %v1436_v12 = vpack.c.bf16 %v850_v7, %v850_v7  ;;  %v853_v14 = vmax.f32 %v845_v8, 0.0  ;;  %v843_v15 = vadd.f32 %v1995_v32, %v821_v9  ;;  %v1106_v16 = vadd.f32 %v1505_v42, %v1495_v10 }
 0x182   : > { %v1097_v17 = vpop.f32.mrf.mxu1  ;;  %v992_v61 = vpop.f32.mrf.mxu0 }
 0x183   : > { %891 = vst.msk [vmem:[%s2002_s14 + $0x20] sm:$0xf] %vm886_vm7, %v1436_v12  ;;  %v1439_v18 = vpack.c.bf16 %v853_v14, %v853_v14  ;;  %v851_v19 = vmax.f32 %v843_v15, 0.0  ;;  %v1130_v20 = vadd.f32 %v1995_v32, %v1106_v16  ;;  %v1098_v13 = vadd.f32 %v1097_v17, %v992_v61 }
 0x184   : > { %v1506_v21 = vpop.f32.mrf.mxu1  ;;  %v1496_v22 = vpop.f32.mrf.mxu0 }
 0x185   : > { %894 = vst.msk [vmem:[%s2002_s14 + $0x34] sm:$0xf] %vm886_vm7, %v1439_v18  ;;  %v1437_v24 = vpack.c.bf16 %v851_v19, %v851_v19  ;;  %v1138_v25 = vmax.f32 %v1130_v20, 0.0  ;;  %v1128_v26 = vadd.f32 %v1995_v32, %v1098_v13  ;;  %v1109_v27 = vadd.f32 %v1506_v21, %v1496_v22 }
 0x186   : > { %v1100_v28 = vpop.f32.mrf.mxu1  ;;  %v995_v29 = vpop.f32.mrf.mxu0 }
 0x187   : > { %892 = vst.msk [vmem:[%s2002_s14 + $0x24] sm:$0xf] %vm886_vm7, %v1437_v24  ;;  %v1442_v30 = vpack.c.bf16 %v1138_v25, %v1138_v25  ;;  %v1136_v31 = vmax.f32 %v1128_v26, 0.0  ;;  %v1131_v33 = vadd.f32 %v1995_v32, %v1109_v27  ;;  %v1101_v34 = vadd.f32 %v1100_v28, %v995_v29 }
 0x188   : > { %v1509_v35 = vpop.f32.mrf.mxu1  ;;  %v1499_v36 = vpop.f32.mrf.mxu0 }
 0x189   : > { %1412 = vst.msk [vmem:[%s2002_s14 + $0x18] sm:$0xf] %vm886_vm7, %v1442_v30  ;;  %v1440_v37 = vpack.c.bf16 %v1136_v31, %v1136_v31  ;;  %v1139_v38 = vmax.f32 %v1131_v33, 0.0  ;;  %v1129_v39 = vadd.f32 %v1995_v32, %v1101_v34  ;;  %v1122_v40 = vadd.f32 %v1509_v35, %v1499_v36 }
 0x18a   : > { %v1113_v41 = vpop.f32.mrf.mxu1  ;;  %v1008_v43 = vpop.f32.mrf.mxu0 }
 0x18b   : > { %1410 = vst.msk [vmem:[%s2002_s14 + $0x8] sm:$0xf] %vm886_vm7, %v1440_v37  ;;  %v1443_v44 = vpack.c.bf16 %v1139_v38, %v1139_v38  ;;  %v1137_v45 = vmax.f32 %v1129_v39, 0.0  ;;  %v1134_v46 = vadd.f32 %v1995_v32, %v1122_v40  ;;  %v1114_v47 = vadd.f32 %v1113_v41, %v1008_v43 }
 0x18c   : > { %v1510_v48 = vpop.f32.mrf.mxu1  ;;  %v1500_v49 = vpop.f32.mrf.mxu0 }
 0x18d   : > { %1413 = vst.msk [vmem:[%s2002_s14 + $0x1c] sm:$0xf] %vm886_vm7, %v1443_v44  ;;  %v1441_v50 = vpack.c.bf16 %v1137_v45, %v1137_v45  ;;  %v1142_v51 = vmax.f32 %v1134_v46, 0.0  ;;  %v1132_v52 = vadd.f32 %v1995_v32, %v1114_v47  ;;  %v1125_v53 = vadd.f32 %v1510_v48, %v1500_v49 }
 0x18e   : > { %v1116_v54 = vpop.f32.mrf.mxu1  ;;  %v1011_v55 = vpop.f32.mrf.mxu0 }
 0x18f   : > { %1411 = vst.msk [vmem:[%s2002_s14 + $0xc] sm:$0xf] %vm886_vm7, %v1441_v50  ;;  %v1446_v56 = vpack.c.bf16 %v1142_v51, %v1142_v51  ;;  %v1140_v5 = vmax.f32 %v1132_v52, 0.0  ;;  %v1135_v57 = vadd.f32 %v1995_v32, %v1125_v53  ;;  %v1117_v11 = vadd.f32 %v1116_v54, %v1011_v55 }
 0x191   : > { %1416 = vst.msk [vmem:[%s2002_s14 + $0x38] sm:$0xf] %vm886_vm7, %v1446_v56  ;;  %v1444_v58 = vpack.c.bf16 %v1140_v5, %v1140_v5  ;;  %v1143_v59 = vmax.f32 %v1135_v57, 0.0  ;;  %v1133_v60 = vadd.f32 %v1995_v32, %v1117_v11 }
 0x193   : > { %1414 = vst.msk [vmem:[%s2002_s14 + $0x28] sm:$0xf] %vm886_vm7, %v1444_v58  ;;  %v1447_v62 = vpack.c.bf16 %v1143_v59, %v1143_v59  ;;  %v1141_v63 = vmax.f32 %v1133_v60, 0.0 }
 0x195   : > { %1417 = vst.msk [vmem:[%s2002_s14 + $0x3c] sm:$0xf] %vm886_vm7, %v1447_v62  ;;  %v1445_v23 = vpack.c.bf16 %v1141_v63, %v1141_v63 }
 0x197   : > { %1415 = vst.msk [vmem:[%s2002_s14 + $0x2c] sm:$0xf] %vm886_vm7, %v1445_v23 }
 0x198   : > { %1643 = shalt.err (!%p1640_p9)
}
 0x199   : > { %s1644_s6 = scalar_lea.hbm %s2055_s8, 1024  ;;  %s1648_s18 = scalar_lea.hbm %s2117_s4, 8192 }
 0x19a   : > { %p1645_p10 = scmp.ne.s32.totalorder %s2055_s8, %s1644_s6  ;;  %p1649_p13 = scmp.lt.s32.totalorder %s2055_s8, %s2117_s4 }
 0x19b   : > { %p1650_p0 = scmp.lt.s32.totalorder %s1648_s18, %s1644_s6 }
 0x19c   : > { %p1646_p11 = pnand %p1645_p10, %p1804_p3 }
 0x19d   : > { %p1651_p1 = por %p1650_p0, %p1649_p13 }
 0x19e   : > { %p1647_p12 = pneg %p1646_p11 }
 0x1a0   : > { %p1652_p2 = pnand %p1651_p1, %p1647_p12 }
 0x1a2   : > { %1655 = shalt.err (!%p1652_p2)
}
 0x1a3   : > { %s1727_s5 = smov 64  }
 0x1a4   : > { %1518 = dma.vmem_to_hbm [thread:$0]  (%p1804_p3), %s2048_s19, 1024, %s2055_s8, %s2061_s10, %s1727_s5, %s1727_s5, %s1725_s11  }
 0x1a5 PF: > { %p1524_p4 = scmp.ge.s32.totalorder %s1722_s22, 2  ;;  %s1217_s12 = sand.u32 1, %s1694_s15  }
 0x1a6   : > { %s1218_s13 = scalar_lea.sflag [#allocation4], %s1217_s12 }
 0x1a7   : > { %p1521_p5 = pnand %p1524_p4, %p1813_p8 }
 0x1a9   : > { %p1522_p6 = pneg %p1521_p5 }
 0x1ab   : > { %1689 = dma.done.wait (%p1522_p6), %s1218_s13, 1024  }
 0x1ac   : > { %1691 = vsyncadd (%p1522_p6), %s1218_s13, 4294966272  ;;  %s17_s22 = sadd.s32 1, %s1722_s22   ;;  %s2120_s15 = smov %s1698_s16 }
 0x1ad   : > { %p14_p7 = scmp.ge.s32.totalorder %s17_s22, 10   ;;  %s2121_s16 = smov %s1702_s17 }
 0x1ae   : > { %s2122_s17 = smov %s1822_s7  ;;  %s2123_s18 = smov %s1714_s20 }
 0x1af   : > { %s2124_s19 = smov %s1718_s21  ;;  %s2125_s20 = smov %s2128_s25 }
 0x1b0   : > { %s2126_s21 = smov %s2132_s26  ;;  %16 = sbr.rel (!%p14_p7) target bundleno = 5 (0x5), region = 81 }
 0x1b5   :  { %1223 = vsyncpa [#allocation4], 1 }
 0x1b6   :  { %1225 = vsyncpa [#allocation4 + $0x1], 1 }

</bundles_post_ra>
